<compile_context>
chip_gen: v7x
topology: tpu7x:2x2x1
jax: 0.10.0
libtpu: 0.0.40
codegen_flags: <defaults>
</compile_context>

<pallas_src>
import functools

import jax
import jax.numpy as jnp
from jax import lax
from jax.experimental import pallas as pl
from jax.experimental.pallas import tpu as pltpu


def _inverted_residual_kernel(x_ref, w1_ref, b1_ref, dw_ref, b2_ref,
                              w2_ref, b3_ref, o_ref, *, H, W):
    HW = H * W
    Ch = w1_ref.shape[0]

    x = x_ref[0].astype(jnp.float32)                                  # (Cin, HW)

    # --- 1x1 expand conv (BN scale folded into w1) + bias + ReLU6 ---
    h = jnp.dot(w1_ref[...], x, preferred_element_type=jnp.float32)   # (Ch, HW)
    h = jnp.clip(h + b1_ref[...], 0.0, 6.0)

    # --- 3x3 depthwise conv, stride 1, pad 1, via lane-rolls + edge masks ---
    pos = lax.broadcasted_iota(jnp.int32, (1, HW), 1)
    col = pos % W
    up_ok = pos >= W                    # reading row y-1 is in-bounds
    down_ok = pos < (HW - W)            # reading row y+1 is in-bounds
    left_ok = col >= 1                  # reading col x-1 is in-bounds
    right_ok = col < (W - 1)            # reading col x+1 is in-bounds

    dwk = dw_ref[...]                                                  # (Ch, 9)
    acc = h * dwk[:, 4:5]                                              # center tap
    for dy in (-1, 0, 1):
        for dx in (-1, 0, 1):
            if dy == 0 and dx == 0:
                continue
            k = (dy + 1) * 3 + (dx + 1)
            off = dy * W + dx
            # shifted[p] = h[p + off]  (circular; wrapped lanes are masked out below)
            shifted = pltpu.roll(h, (-off) % HW, axis=1)
            if dy == -1:
                mask = up_ok
            elif dy == 1:
                mask = down_ok
            else:
                mask = None
            if dx == -1:
                mask = left_ok if mask is None else (mask & left_ok)
            elif dx == 1:
                mask = right_ok if mask is None else (mask & right_ok)
            acc = acc + jnp.where(mask, shifted, 0.0) * dwk[:, k:k + 1]

    h2 = jnp.clip(acc + b2_ref[...], 0.0, 6.0)                         # (Ch, HW)

    # --- 1x1 projection conv (BN scale folded into w2) + bias + identity residual ---
    out = jnp.dot(w2_ref[...], h2, preferred_element_type=jnp.float32)  # (Cout, HW)
    o_ref[0] = (out + b3_ref[...] + x).astype(o_ref.dtype)             # lane-dense store


def inverted_residual(x_nchw, params, *, stride=1):
    """x_nchw: (N, Cin, H, W) NCHW.  Returns (N, Cout, H, W) NCHW."""
    w1, s1, b1, dw, s2, b2, w2, s3, b3 = params
    N, Cin, H, W = x_nchw.shape
    Ch = w1.shape[1]
    Cout = w2.shape[1]
    if not (stride == 1 and Cin == Cout):
        raise NotImplementedError(
            "Pallas kernel implements the identity branch (stride=1, inp==oup).")
    HW = H * W

    # Fold BN scales into conv weights (inference-mode BN); keep only bias adds.
    w1_f = (w1 * s1.reshape(1, Ch)).T.astype(jnp.float32)     # (Ch, Cin)
    dw_f = (dw * s2.reshape(1, Ch)).T.astype(jnp.float32)     # (Ch, 9)
    w2_f = (w2 * s3.reshape(1, Cout)).T.astype(jnp.float32)   # (Cout, Ch)
    b1_c = b1.reshape(Ch, 1).astype(jnp.float32)
    b2_c = b2.reshape(Ch, 1).astype(jnp.float32)
    b3_c = b3.reshape(Cout, 1).astype(jnp.float32)

    x_flat = x_nchw.reshape(N, Cin, HW)                        # free reshape, stays NCHW

    kernel = functools.partial(_inverted_residual_kernel, H=H, W=W)

    flops = N * (2 * HW * Cin * Ch + 2 * 9 * HW * Ch + 2 * HW * Ch * Cout)
    bytes_accessed = 4 * (N * Cin * HW + N * Cout * HW
                          + Ch * Cin + Ch * 9 + Cout * Ch + 2 * Ch + Cout)

    out = pl.pallas_call(
        kernel,
        out_shape=jax.ShapeDtypeStruct((N, Cout, HW), x_nchw.dtype),
        grid_spec=pltpu.PrefetchScalarGridSpec(
            num_scalar_prefetch=0,
            grid=(N,),
            in_specs=[
                pl.BlockSpec((1, Cin, HW), lambda n: (n, 0, 0)),
                pl.BlockSpec((Ch, Cin), lambda n: (0, 0)),
                pl.BlockSpec((Ch, 1), lambda n: (0, 0)),
                pl.BlockSpec((Ch, 9), lambda n: (0, 0)),
                pl.BlockSpec((Ch, 1), lambda n: (0, 0)),
                pl.BlockSpec((Cout, Ch), lambda n: (0, 0)),
                pl.BlockSpec((Cout, 1), lambda n: (0, 0)),
            ],
            out_specs=pl.BlockSpec((1, Cout, HW), lambda n: (n, 0, 0)),
        ),
        compiler_params=pltpu.CompilerParams(
            dimension_semantics=("parallel",)),
        cost_estimate=pl.CostEstimate(
            flops=flops, transcendentals=0, bytes_accessed=bytes_accessed),
    )(x_flat, w1_f, b1_c, dw_f, b2_c, w2_f, b3_c)

    return out.reshape(N, Cout, H, W)


def reference(x_nchw, params):
    """Pure-JAX reference (lax convs) mirroring the PyTorch forward in eval mode."""
    w1, s1, b1, dw, s2, b2, w2, s3, b3 = params
    Cin = x_nchw.shape[1]
    Ch = w1.shape[1]
    Cout = w2.shape[1]
    dn = ("NHWC", "HWIO", "NHWC")

    x = jnp.transpose(x_nchw, (0, 2, 3, 1)).astype(jnp.float32)
    h = lax.conv_general_dilated(x, w1.reshape(1, 1, Cin, Ch), (1, 1), "VALID",
                                 dimension_numbers=dn)
    h = jnp.clip(h * s1.reshape(1, 1, 1, Ch) + b1.reshape(1, 1, 1, Ch), 0.0, 6.0)
    h = lax.conv_general_dilated(h, dw.reshape(3, 3, 1, Ch), (1, 1),
                                 ((1, 1), (1, 1)), dimension_numbers=dn,
                                 feature_group_count=Ch)
    h = jnp.clip(h * s2.reshape(1, 1, 1, Ch) + b2.reshape(1, 1, 1, Ch), 0.0, 6.0)
    o = lax.conv_general_dilated(h, w2.reshape(1, 1, Ch, Cout), (1, 1), "VALID",
                                 dimension_numbers=dn)
    o = o * s3.reshape(1, 1, 1, Cout) + b3.reshape(1, 1, 1, Cout)
    o = o + x
    return jnp.transpose(o, (0, 3, 1, 2))


def make_params(key, inp, oup, expand_ratio):
    hidden = int(round(inp * expand_ratio))
    eps = 1e-5
    ks = jax.random.split(key, 15)

    def bn(kg, kb, km, kv, c):
        gamma = jax.random.uniform(kg, (c,), jnp.float32, 0.5, 1.5)
        beta = 0.1 * jax.random.normal(kb, (c,), jnp.float32)
        mean = 0.1 * jax.random.normal(km, (c,), jnp.float32)
        var = jax.random.uniform(kv, (c,), jnp.float32, 0.5, 1.5)
        scale = gamma / jnp.sqrt(var + eps)
        shift = beta - mean * scale
        return scale.reshape(1, c), shift.reshape(1, c)

    w1 = 0.3 * jax.random.normal(ks[0], (inp, hidden), jnp.float32)     # 1x1 expand
    dw = 0.3 * jax.random.normal(ks[1], (9, hidden), jnp.float32)       # 3x3 depthwise taps
    w2 = 0.3 * jax.random.normal(ks[2], (hidden, oup), jnp.float32)     # 1x1 project
    s1, b1 = bn(ks[3], ks[4], ks[5], ks[6], hidden)
    s2, b2 = bn(ks[7], ks[8], ks[9], ks[10], hidden)
    s3, b3 = bn(ks[11], ks[12], ks[13], ks[14], oup)
    return (w1, s1, b1, dw, s2, b2, w2, s3, b3)


if __name__ == "__main__":
    # Module config: inp=oup=4, stride=1, expand_ratio=6 -> hidden=24, identity branch.
    N, Cin, H, W = 2, 4, 16, 16
    oup, expand_ratio = 4, 6

    key = jax.random.PRNGKey(0)
    kx, kp = jax.random.split(key)
    x = jax.random.normal(kx, (N, Cin, H, W), jnp.float32)              # NCHW like PyTorch
    params = make_params(kp, Cin, oup, expand_ratio)

    out = jax.block_until_ready(inverted_residual(x, params))
    ref = jax.block_until_ready(reference(x, params))

    assert out.shape == (N, oup, H, W)
    assert jnp.allclose(out, ref, rtol=2e-4, atol=2e-4), "mismatch vs JAX reference"
    print("KERNEL_OK")
</pallas_src>

<mosaic_0001>
module attributes {stable_mosaic.version = 11 : i64} {
  func.func @_inverted_residual_kernel(%arg0: i32, %arg1: memref<1x4x256xf32, #tpu.memory_space<vmem>>, %arg2: memref<24x4xf32, #tpu.memory_space<vmem>>, %arg3: memref<24x1xf32, #tpu.memory_space<vmem>>, %arg4: memref<24x9xf32, #tpu.memory_space<vmem>>, %arg5: memref<24x1xf32, #tpu.memory_space<vmem>>, %arg6: memref<4x24xf32, #tpu.memory_space<vmem>>, %arg7: memref<4x1xf32, #tpu.memory_space<vmem>>, %arg8: memref<1x4x256xf32, #tpu.memory_space<vmem>>) attributes {dimension_semantics = [#tpu.dimension_semantics<parallel>], iteration_bounds = array<i64: 2>, scalar_prefetch = 0 : i64, scratch_operands = 0 : i64, tpu.core_type = #tpu.core_type<tc>, window_params = [{transform_indices = @transform_0, window_bounds = array<i64: 1, 4, 256>}, {pipeline_mode = #tpu.pipeline_mode<synchronous>, transform_indices = @transform_1, window_bounds = array<i64: 24, 4>}, {pipeline_mode = #tpu.pipeline_mode<synchronous>, transform_indices = @transform_2, window_bounds = array<i64: 24, 1>}, {pipeline_mode = #tpu.pipeline_mode<synchronous>, transform_indices = @transform_3, window_bounds = array<i64: 24, 9>}, {pipeline_mode = #tpu.pipeline_mode<synchronous>, transform_indices = @transform_4, window_bounds = array<i64: 24, 1>}, {pipeline_mode = #tpu.pipeline_mode<synchronous>, transform_indices = @transform_5, window_bounds = array<i64: 4, 24>}, {pipeline_mode = #tpu.pipeline_mode<synchronous>, transform_indices = @transform_6, window_bounds = array<i64: 4, 1>}, {transform_indices = @transform_7, window_bounds = array<i64: 1, 4, 256>}]} {
    %c0 = arith.constant 0 : index
    %c0_0 = arith.constant 0 : index
    %c0_1 = arith.constant 0 : index
    %0 = vector.load %arg1[%c0, %c0_0, %c0_1] : memref<1x4x256xf32, #tpu.memory_space<vmem>>, vector<1x4x256xf32>
    %1 = vector.shape_cast %0 : vector<1x4x256xf32> to vector<4x256xf32>
    %c0_2 = arith.constant 0 : index
    %c0_3 = arith.constant 0 : index
    %2 = vector.load %arg2[%c0_2, %c0_3] : memref<24x4xf32, #tpu.memory_space<vmem>>, vector<24x4xf32>
    %cst = arith.constant dense<0.000000e+00> : vector<24x256xf32>
    %3 = tpu.matmul %2, %1, %cst {dimension_numbers = #tpu.dot_dimension_numbers<[1], [0], [0], [1], [0, 0, 1, 1], [], []>} : vector<24x4xf32>, vector<4x256xf32>, vector<24x256xf32> -> vector<24x256xf32>
    %c0_4 = arith.constant 0 : index
    %c0_5 = arith.constant 0 : index
    %4 = vector.load %arg3[%c0_4, %c0_5] : memref<24x1xf32, #tpu.memory_space<vmem>>, vector<24x1xf32>
    %5 = vector.broadcast %4 : vector<24x1xf32> to vector<24x256xf32>
    %6 = arith.addf %3, %5 : vector<24x256xf32>
    %cst_6 = arith.constant 0.000000e+00 : f32
    %cst_7 = arith.constant 6.000000e+00 : f32
    %7 = vector.broadcast %cst_6 : f32 to vector<24x256xf32>
    %8 = arith.maximumf %7, %6 : vector<24x256xf32>
    %9 = vector.broadcast %cst_7 : f32 to vector<24x256xf32>
    %10 = arith.minimumf %9, %8 : vector<24x256xf32>
    %11 = tpu.iota {dimensions = array<i32: 1>} : vector<1x256xi32>
    %c16_i32 = arith.constant 16 : i32
    %c0_i32 = arith.constant 0 : i32
    %12 = arith.cmpi eq, %c16_i32, %c0_i32 : i32
    %c1_i32 = arith.constant 1 : i32
    %13 = arith.select %12, %c1_i32, %c16_i32 : i32
    %14 = vector.broadcast %13 : i32 to vector<1x256xi32>
    %15 = arith.remsi %11, %14 : vector<1x256xi32>
    %c0_i32_8 = arith.constant 0 : i32
    %16 = vector.broadcast %c0_i32_8 : i32 to vector<1x256xi32>
    %17 = arith.cmpi ne, %15, %16 : vector<1x256xi32>
    %c0_i32_9 = arith.constant 0 : i32
    %18 = vector.broadcast %c0_i32_9 : i32 to vector<1x256xi32>
    %19 = arith.cmpi slt, %15, %18 : vector<1x256xi32>
    %c0_i32_10 = arith.constant 0 : i32
    %20 = arith.cmpi slt, %13, %c0_i32_10 : i32
    %21 = vector.broadcast %20 : i1 to vector<1x256xi1>
    %22 = vector.broadcast %21 : vector<1x256xi1> to vector<1x256xi1>
    %23 = arith.xori %19, %22 : vector<1x256xi1>
    %24 = arith.andi %23, %17 : vector<1x256xi1>
    %25 = vector.broadcast %13 : i32 to vector<1x256xi32>
    %26 = arith.addi %15, %25 : vector<1x256xi32>
    %27 = arith.select %24, %26, %15 : vector<1x256xi1>, vector<1x256xi32>
    %c16_i32_11 = arith.constant 16 : i32
    %28 = vector.broadcast %c16_i32_11 : i32 to vector<1x256xi32>
    %29 = arith.cmpi sge, %11, %28 : vector<1x256xi32>
    %c240_i32 = arith.constant 240 : i32
    %30 = vector.broadcast %c240_i32 : i32 to vector<1x256xi32>
    %31 = arith.cmpi slt, %11, %30 : vector<1x256xi32>
    %c1_i32_12 = arith.constant 1 : i32
    %32 = vector.broadcast %c1_i32_12 : i32 to vector<1x256xi32>
    %33 = arith.cmpi sge, %27, %32 : vector<1x256xi32>
    %c15_i32 = arith.constant 15 : i32
    %34 = vector.broadcast %c15_i32 : i32 to vector<1x256xi32>
    %35 = arith.cmpi slt, %27, %34 : vector<1x256xi32>
    %c0_13 = arith.constant 0 : index
    %c0_14 = arith.constant 0 : index
    %36 = vector.load %arg4[%c0_13, %c0_14] : memref<24x9xf32, #tpu.memory_space<vmem>>, vector<24x9xf32>
    %37 = vector.extract_strided_slice %36 {offsets = [0, 4], sizes = [24, 1], strides = [1, 1]} : vector<24x9xf32> to vector<24x1xf32>
    %38 = vector.broadcast %37 : vector<24x1xf32> to vector<24x256xf32>
    %39 = arith.mulf %10, %38 : vector<24x256xf32>
    %c17_i32 = arith.constant 17 : i32
    %40 = tpu.dynamic_rotate %10 by %c17_i32 dim 1 : vector<24x256xf32>, i32 -> vector<24x256xf32>
    %41 = arith.andi %29, %33 : vector<1x256xi1>
    %cst_15 = arith.constant 0.000000e+00 : f32
    %42 = vector.shape_cast %41 : vector<1x256xi1> to vector<1x256xi1>
    %43 = vector.broadcast %42 : vector<1x256xi1> to vector<24x256xi1>
    %44 = vector.broadcast %cst_15 : f32 to vector<24x256xf32>
    %45 = arith.select %43, %40, %44 : vector<24x256xi1>, vector<24x256xf32>
    %46 = vector.extract_strided_slice %36 {offsets = [0, 0], sizes = [24, 1], strides = [1, 1]} : vector<24x9xf32> to vector<24x1xf32>
    %47 = vector.broadcast %46 : vector<24x1xf32> to vector<24x256xf32>
    %48 = arith.mulf %45, %47 : vector<24x256xf32>
    %49 = arith.addf %39, %48 : vector<24x256xf32>
    %c16_i32_16 = arith.constant 16 : i32
    %50 = tpu.dynamic_rotate %10 by %c16_i32_16 dim 1 : vector<24x256xf32>, i32 -> vector<24x256xf32>
    %cst_17 = arith.constant 0.000000e+00 : f32
    %51 = vector.shape_cast %29 : vector<1x256xi1> to vector<1x256xi1>
    %52 = vector.broadcast %51 : vector<1x256xi1> to vector<24x256xi1>
    %53 = vector.broadcast %cst_17 : f32 to vector<24x256xf32>
    %54 = arith.select %52, %50, %53 : vector<24x256xi1>, vector<24x256xf32>
    %55 = vector.extract_strided_slice %36 {offsets = [0, 1], sizes = [24, 1], strides = [1, 1]} : vector<24x9xf32> to vector<24x1xf32>
    %56 = vector.broadcast %55 : vector<24x1xf32> to vector<24x256xf32>
    %57 = arith.mulf %54, %56 : vector<24x256xf32>
    %58 = arith.addf %49, %57 : vector<24x256xf32>
    %c15_i32_18 = arith.constant 15 : i32
    %59 = tpu.dynamic_rotate %10 by %c15_i32_18 dim 1 : vector<24x256xf32>, i32 -> vector<24x256xf32>
    %60 = arith.andi %29, %35 : vector<1x256xi1>
    %cst_19 = arith.constant 0.000000e+00 : f32
    %61 = vector.shape_cast %60 : vector<1x256xi1> to vector<1x256xi1>
    %62 = vector.broadcast %61 : vector<1x256xi1> to vector<24x256xi1>
    %63 = vector.broadcast %cst_19 : f32 to vector<24x256xf32>
    %64 = arith.select %62, %59, %63 : vector<24x256xi1>, vector<24x256xf32>
    %65 = vector.extract_strided_slice %36 {offsets = [0, 2], sizes = [24, 1], strides = [1, 1]} : vector<24x9xf32> to vector<24x1xf32>
    %66 = vector.broadcast %65 : vector<24x1xf32> to vector<24x256xf32>
    %67 = arith.mulf %64, %66 : vector<24x256xf32>
    %68 = arith.addf %58, %67 : vector<24x256xf32>
    %c1_i32_20 = arith.constant 1 : i32
    %69 = tpu.dynamic_rotate %10 by %c1_i32_20 dim 1 : vector<24x256xf32>, i32 -> vector<24x256xf32>
    %cst_21 = arith.constant 0.000000e+00 : f32
    %70 = vector.shape_cast %33 : vector<1x256xi1> to vector<1x256xi1>
    %71 = vector.broadcast %70 : vector<1x256xi1> to vector<24x256xi1>
    %72 = vector.broadcast %cst_21 : f32 to vector<24x256xf32>
    %73 = arith.select %71, %69, %72 : vector<24x256xi1>, vector<24x256xf32>
    %74 = vector.extract_strided_slice %36 {offsets = [0, 3], sizes = [24, 1], strides = [1, 1]} : vector<24x9xf32> to vector<24x1xf32>
    %75 = vector.broadcast %74 : vector<24x1xf32> to vector<24x256xf32>
    %76 = arith.mulf %73, %75 : vector<24x256xf32>
    %77 = arith.addf %68, %76 : vector<24x256xf32>
    %c255_i32 = arith.constant 255 : i32
    %78 = tpu.dynamic_rotate %10 by %c255_i32 dim 1 : vector<24x256xf32>, i32 -> vector<24x256xf32>
    %cst_22 = arith.constant 0.000000e+00 : f32
    %79 = vector.shape_cast %35 : vector<1x256xi1> to vector<1x256xi1>
    %80 = vector.broadcast %79 : vector<1x256xi1> to vector<24x256xi1>
    %81 = vector.broadcast %cst_22 : f32 to vector<24x256xf32>
    %82 = arith.select %80, %78, %81 : vector<24x256xi1>, vector<24x256xf32>
    %83 = vector.extract_strided_slice %36 {offsets = [0, 5], sizes = [24, 1], strides = [1, 1]} : vector<24x9xf32> to vector<24x1xf32>
    %84 = vector.broadcast %83 : vector<24x1xf32> to vector<24x256xf32>
    %85 = arith.mulf %82, %84 : vector<24x256xf32>
    %86 = arith.addf %77, %85 : vector<24x256xf32>
    %c241_i32 = arith.constant 241 : i32
    %87 = tpu.dynamic_rotate %10 by %c241_i32 dim 1 : vector<24x256xf32>, i32 -> vector<24x256xf32>
    %88 = arith.andi %31, %33 : vector<1x256xi1>
    %cst_23 = arith.constant 0.000000e+00 : f32
    %89 = vector.shape_cast %88 : vector<1x256xi1> to vector<1x256xi1>
    %90 = vector.broadcast %89 : vector<1x256xi1> to vector<24x256xi1>
    %91 = vector.broadcast %cst_23 : f32 to vector<24x256xf32>
    %92 = arith.select %90, %87, %91 : vector<24x256xi1>, vector<24x256xf32>
    %93 = vector.extract_strided_slice %36 {offsets = [0, 6], sizes = [24, 1], strides = [1, 1]} : vector<24x9xf32> to vector<24x1xf32>
    %94 = vector.broadcast %93 : vector<24x1xf32> to vector<24x256xf32>
    %95 = arith.mulf %92, %94 : vector<24x256xf32>
    %96 = arith.addf %86, %95 : vector<24x256xf32>
    %c240_i32_24 = arith.constant 240 : i32
    %97 = tpu.dynamic_rotate %10 by %c240_i32_24 dim 1 : vector<24x256xf32>, i32 -> vector<24x256xf32>
    %cst_25 = arith.constant 0.000000e+00 : f32
    %98 = vector.shape_cast %31 : vector<1x256xi1> to vector<1x256xi1>
    %99 = vector.broadcast %98 : vector<1x256xi1> to vector<24x256xi1>
    %100 = vector.broadcast %cst_25 : f32 to vector<24x256xf32>
    %101 = arith.select %99, %97, %100 : vector<24x256xi1>, vector<24x256xf32>
    %102 = vector.extract_strided_slice %36 {offsets = [0, 7], sizes = [24, 1], strides = [1, 1]} : vector<24x9xf32> to vector<24x1xf32>
    %103 = vector.broadcast %102 : vector<24x1xf32> to vector<24x256xf32>
    %104 = arith.mulf %101, %103 : vector<24x256xf32>
    %105 = arith.addf %96, %104 : vector<24x256xf32>
    %c239_i32 = arith.constant 239 : i32
    %106 = tpu.dynamic_rotate %10 by %c239_i32 dim 1 : vector<24x256xf32>, i32 -> vector<24x256xf32>
    %107 = arith.andi %31, %35 : vector<1x256xi1>
    %cst_26 = arith.constant 0.000000e+00 : f32
    %108 = vector.shape_cast %107 : vector<1x256xi1> to vector<1x256xi1>
    %109 = vector.broadcast %108 : vector<1x256xi1> to vector<24x256xi1>
    %110 = vector.broadcast %cst_26 : f32 to vector<24x256xf32>
    %111 = arith.select %109, %106, %110 : vector<24x256xi1>, vector<24x256xf32>
    %112 = vector.extract_strided_slice %36 {offsets = [0, 8], sizes = [24, 1], strides = [1, 1]} : vector<24x9xf32> to vector<24x1xf32>
    %113 = vector.broadcast %112 : vector<24x1xf32> to vector<24x256xf32>
    %114 = arith.mulf %111, %113 : vector<24x256xf32>
    %115 = arith.addf %105, %114 : vector<24x256xf32>
    %c0_27 = arith.constant 0 : index
    %c0_28 = arith.constant 0 : index
    %116 = vector.load %arg5[%c0_27, %c0_28] : memref<24x1xf32, #tpu.memory_space<vmem>>, vector<24x1xf32>
    %117 = vector.broadcast %116 : vector<24x1xf32> to vector<24x256xf32>
    %118 = arith.addf %115, %117 : vector<24x256xf32>
    %cst_29 = arith.constant 0.000000e+00 : f32
    %cst_30 = arith.constant 6.000000e+00 : f32
    %119 = vector.broadcast %cst_29 : f32 to vector<24x256xf32>
    %120 = arith.maximumf %119, %118 : vector<24x256xf32>
    %121 = vector.broadcast %cst_30 : f32 to vector<24x256xf32>
    %122 = arith.minimumf %121, %120 : vector<24x256xf32>
    %c0_31 = arith.constant 0 : index
    %c0_32 = arith.constant 0 : index
    %123 = vector.load %arg6[%c0_31, %c0_32] : memref<4x24xf32, #tpu.memory_space<vmem>>, vector<4x24xf32>
    %cst_33 = arith.constant dense<0.000000e+00> : vector<4x256xf32>
    %124 = tpu.matmul %123, %122, %cst_33 {dimension_numbers = #tpu.dot_dimension_numbers<[1], [0], [0], [1], [0, 0, 1, 1], [], []>} : vector<4x24xf32>, vector<24x256xf32>, vector<4x256xf32> -> vector<4x256xf32>
    %c0_34 = arith.constant 0 : index
    %c0_35 = arith.constant 0 : index
    %125 = vector.load %arg7[%c0_34, %c0_35] : memref<4x1xf32, #tpu.memory_space<vmem>>, vector<4x1xf32>
    %126 = vector.broadcast %125 : vector<4x1xf32> to vector<4x256xf32>
    %127 = arith.addf %124, %126 : vector<4x256xf32>
    %128 = arith.addf %127, %1 : vector<4x256xf32>
    %c0_36 = arith.constant 0 : index
    %c0_37 = arith.constant 0 : index
    %c0_38 = arith.constant 0 : index
    %129 = vector.load %arg8[%c0_36, %c0_37, %c0_38] : memref<1x4x256xf32, #tpu.memory_space<vmem>>, vector<1x4x256xf32>
    %130 = vector.shape_cast %129 : vector<1x4x256xf32> to vector<4x256xf32>
    %131 = vector.shape_cast %128 : vector<4x256xf32> to vector<1x4x256xf32>
    tpu.vector_store %arg8[%c0_36, %c0_37, %c0_38], %131 {strides = array<i32>} : memref<1x4x256xf32, #tpu.memory_space<vmem>>, vector<1x4x256xf32>,
    return
  }
  func.func @transform_0(%arg0: i32) -> (i32, i32, i32) {
    %c0_i32 = arith.constant 0 : i32
    %c0_i32_0 = arith.constant 0 : i32
    %c0_i32_1 = arith.constant 0 : i32
    return %arg0, %c0_i32, %c0_i32_0 : i32, i32, i32
  }
  func.func @transform_1(%arg0: i32) -> (i32, i32) {
    %c0_i32 = arith.constant 0 : i32
    %c0_i32_0 = arith.constant 0 : i32
    %c0_i32_1 = arith.constant 0 : i32
    return %c0_i32, %c0_i32_0 : i32, i32
  }
  func.func @transform_2(%arg0: i32) -> (i32, i32) {
    %c0_i32 = arith.constant 0 : i32
    %c0_i32_0 = arith.constant 0 : i32
    %c0_i32_1 = arith.constant 0 : i32
    return %c0_i32, %c0_i32_0 : i32, i32
  }
  func.func @transform_3(%arg0: i32) -> (i32, i32) {
    %c0_i32 = arith.constant 0 : i32
    %c0_i32_0 = arith.constant 0 : i32
    %c0_i32_1 = arith.constant 0 : i32
    return %c0_i32, %c0_i32_0 : i32, i32
  }
  func.func @transform_4(%arg0: i32) -> (i32, i32) {
    %c0_i32 = arith.constant 0 : i32
    %c0_i32_0 = arith.constant 0 : i32
    %c0_i32_1 = arith.constant 0 : i32
    return %c0_i32, %c0_i32_0 : i32, i32
  }
  func.func @transform_5(%arg0: i32) -> (i32, i32) {
    %c0_i32 = arith.constant 0 : i32
    %c0_i32_0 = arith.constant 0 : i32
    %c0_i32_1 = arith.constant 0 : i32
    return %c0_i32, %c0_i32_0 : i32, i32
  }
  func.func @transform_6(%arg0: i32) -> (i32, i32) {
    %c0_i32 = arith.constant 0 : i32
    %c0_i32_0 = arith.constant 0 : i32
    %c0_i32_1 = arith.constant 0 : i32
    return %c0_i32, %c0_i32_0 : i32, i32
  }
  func.func @transform_7(%arg0: i32) -> (i32, i32, i32) {
    %c0_i32 = arith.constant 0 : i32
    %c0_i32_0 = arith.constant 0 : i32
    %c0_i32_1 = arith.constant 0 : i32
    return %arg0, %c0_i32, %c0_i32_0 : i32, i32, i32
  }
}

</mosaic_0001>

<bundles_post_ra>
// kernel: tpu_custom_call.1
= control target key start
LH: loop header
LB: loop body
LE: loop exit
PB: predicated region body
PF: predicated region fallthrough
CT: control target
= control target key end

     0   :  { %12 = vsyncpa [#allocation3], 0  ;;  %s2027_s0 = inlined_call_operand.vmem [shape: f32[2,4,256], index: 0, kind: input, shape index: {}]   ;;  %s2028_s1 = inlined_call_operand.vmem [shape: f32[24,4], index: 1, kind: input, shape index: {}]   ;;  %s2029_s2 = inlined_call_operand.vmem [shape: f32[24,1], index: 2, kind: input, shape index: {}]   ;;  %s2030_s3 = inlined_call_operand.vmem [shape: f32[24,9], index: 3, kind: input, shape index: {}]   ;;  %s2031_s4 = inlined_call_operand.vmem [shape: f32[24,1], index: 4, kind: input, shape index: {}]   ;;  %s2032_s5 = inlined_call_operand.vmem [shape: f32[4,24], index: 5, kind: input, shape index: {}]   ;;  %s2033_s6 = inlined_call_operand.vmem [shape: f32[4,1], index: 6, kind: input, shape index: {}]   ;;  %s2034_s7 = inlined_call_operand.hbm [shape: f32[2,4,256], index: 7, kind: output, shape index: {}]  }
   0x1   :  { %14 = vsyncpa [#allocation3 + $0x1], 0  ;;  %s1329_s24 = smov 0   ;;  %s1331_s25 = smov 0  }
   0x2   :  { %s1333_s26 = smov 0   ;;  %s1335_s27 = smov 0  }
   0x3 LB: > { %s1350_s28 = sadd.s32 4294967295, %s1268_s27   ;;  %s1102_s29 = sadd.s32 4294967294, %s1268_s27   ;;  %s1268_s27 = sphi %s1335_s27, %s2094_s27   ;;  %s1264_s26 = sphi %s1333_s26, %s2093_s26   ;;  %s1260_s25 = sphi %s1331_s25, %s2092_s25   ;;  %s1256_s24 = sphi %s1329_s24, %s2091_s24  }
   0x4   : > { %s1354_s30 = sadd.s32 1, %s1268_s27   ;;  %s179_s8 = sadd.s32 1, %s1264_s26 }
   0x5   : > { %s176_s9 = ssub.s32 %s1268_s27, %s1354_s30  ;;  %p189_p0 = scmp.ne.s32.totalorder %s1264_s26, %s1260_s25 }
   0x6   : > { %p177_p1 = scmp.eq.s32.totalorder %s176_s9, 0  ;;  %p190_p2 = scmp.eq.s32.totalorder %s1350_s28, 1 }
   0x7   : > { %p195_p3 = scmp.ne.s32.totalorder %s1260_s25, %s1256_s24  ;;  %p196_p4 = scmp.eq.s32.totalorder %s1102_s29, 1 }
   0x8   : > { %s1365_s10 = scalar_select %p177_p1, %s1264_s26, %s179_s8  }
   0x9   : > { %p1367_p5 = por %p190_p2, %p189_p0  ;;  %p1371_p6 = por %p196_p4, %p195_p3 }
   0xa   : > { %p1105_p7 = scmp.ge.s32.totalorder %s1268_s27, 1  ;;  %p240_p8 = scmp.lt.s32.totalorder %s1268_s27, 3 }
   0xc   : > { %p241_p9 = pnand %p1105_p7, %p240_p8 }
   0xe   : > { %244 = sbr.rel (%p241_p9) target bundleno = 724 (0x2d4), region = 48 }
  0x15   : > { %p272_p10 = scmp.lt.s32.totalorder %s1350_s28, 1  ;;  %v1270_v0 = vmov 0.0   ;;  %v281_v1 = vld [vmem:[%s2029_s2] sm:$0xff]  ;;  %v1271_v2 = vmov 0   ;;  %v283_v3 = vld [vmem:[%s2029_s2 + $0x10] sm:$0xff]  ;;  %v282_v4 = vld [vmem:[%s2029_s2 + $0x8] sm:$0xff] }
  0x16   : > { %380 = vmatprep.mubr.f32.mxu0 %v1270_v0  ;;  %1013 = vmatprep.mubr.f32.mxu1 %v1270_v0  ;;  %v1396_v5 = vld [vmem:[%s2030_s3] sm:$0xff]  ;;  %vm311_vm0 = vcmask 1043456   ;;  %v1272_v8 = vmov 4   ;;  %vm301_vm1 = vcmask 31744   ;;  %v447_v10 = vld [vmem:[%s2030_s3 + $0x8] sm:$0xff]  ;;  %v448_v12 = vld [vmem:[%s2030_s3 + $0x10] sm:$0xff] }
  0x17   : > { %s273_s15 = scalar_select %p272_p10, %s1350_s28, 1  ;;  %1183 = vset.pattern.permute.xlu0 %v1271_v2  ;;  %1184 = vset.pattern.permute.xlu1 %v1271_v2  ;;  %v278_v9 = vld [vmem:[%s2028_s1] sm:$0xff]  ;;  %v279_v11 = vld [vmem:[%s2028_s1 + $0x8] sm:$0xff]  ;;  %v280_v13 = vld [vmem:[%s2028_s1 + $0x10] sm:$0xff]  ;;  %v1273_v14 = vmov 1   ;;  %v1274_v15 = vmov 2  }
  0x18   : > { %286 = vperm.xlu0 %1183, %v281_v1   ;;  %296 = vperm.xlu1 %1184, %v283_v3   ;;  %v1275_v16 = vmov 3   ;;  %v1276_v17 = vmov 5   ;;  %v1277_v18 = vmov 6   ;;  %v1278_v19 = vmov 7   ;;  %v902_v21 = vld [vmem:[%s2031_s4] sm:$0xff]  ;;  %v903_v22 = vld [vmem:[%s2031_s4 + $0x8] sm:$0xff] }
  0x19   : > { %s1120_s18 = sshll.u32 %s273_s15, 3  ;;  %v1279_v20 = vmov 8   ;;  %s1280_s9 = smov 15   ;;  %v904_v63 = vld [vmem:[%s2031_s4 + $0x10] sm:$0xff] }
  0x1a   : > { %s276_s23 = scalar_lea.vmem %s2027_s0, %s1120_s18  ;;  %s1281_s13 = smov 17  }
  0x1b   : > { %v1398_v6 = vld [vmem:[%s276_s23] sm:$0xff]  ;;  %s1282_s14 = smov 1   ;;  %s1283_s15 = smov 16  }
  0x1c   : > { %2050 = vst [vmem:[#allocation5_spill] sm:$0xff] %v1398_v6  ;;  %v1402_v7 = vcombine.high %v1398_v6, %v1398_v6  ;;  %291 = vperm.xlu0 %1183, %v282_v4   ;;  %1185 = vset.pattern.permute.xlu1 %v1272_v8  ;;  %s1284_s16 = smov 127   ;;  %s1285_s17 = smov 113  }
  0x1d   : > { %451 = vperm.xlu1 %1185, %v1396_v5   ;;  %s1286_s18 = smov 112   ;;  %s1287_s19 = smov 111  }
  0x1e   : > { %2051 = vst [vmem:[#allocation6_spill] sm:$0xff] %v1402_v7  ;;  %1109 = vmatprep.subr.msk.mxu0 %vm311_vm0, %v1402_v7 }
  0x1f   : > { %1110 = vmatpush1.msk.msra.mxu0 %vm311_vm0, %v1398_v6 }
  0x20   : > { %1111 = vmatmul.mubr.msk.f32.vlgmr.msra.gmra.mrb[0].mxu0 %vm301_vm1, %v278_v9  ;;  %1186 = vset.pattern.permute.xlu0 %v1272_v8 }
  0x21   : > { %386 = vmatprep.mubr.f32.mxu0 %v1270_v0  ;;  %456 = vperm.xlu0 %1186, %v447_v10  }
  0x22   : > { %1187 = vset.pattern.permute.xlu1 %v1271_v2 }
  0x23   : > { %502 = vperm.xlu1 %1187, %v1396_v5  }
  0x24   : > { %1112 = vmatmul.mubr.msk.f32.gmra.mrb[2].mxu0 %vm301_vm1, %v279_v11 }
  0x25   : > { %392 = vmatprep.mubr.f32.mxu0 %v1270_v0  ;;  %461 = vperm.xlu0 %1186, %v448_v12  }
  0x27   : > { %506 = vperm.xlu1 %1187, %v447_v10  }
  0x28   : > { %1113 = vmatmul.mubr.msk.f32.gmra.mrb[4].mxu0 %vm301_vm1, %v280_v13 }
  0x29   : > { %1190 = vset.pattern.permute.xlu0 %v1273_v14 }
  0x2a   : > { %555 = vperm.xlu0 %1190, %v1396_v5  }
  0x2b   : > { %1188 = vset.pattern.permute.xlu1 %v1273_v14 }
  0x2c   : > { %559 = vperm.xlu1 %1188, %v447_v10  }
  0x2e   : > { %563 = vperm.xlu0 %1190, %v448_v12  }
  0x30   : > { %1189 = vset.pattern.permute.xlu1 %v1274_v15 }
  0x31   : > { %610 = vperm.xlu1 %1189, %v1396_v5  }
  0x32   : > { %1193 = vset.pattern.permute.xlu0 %v1274_v15 }
  0x33   : > { %614 = vperm.xlu0 %1193, %v447_v10  }
  0x35   : > { %1191 = vset.pattern.permute.xlu1 %v1271_v2 }
  0x36   : > { %510 = vperm.xlu1 %1191, %v448_v12  }
  0x37   : > { %618 = vperm.xlu0 %1193, %v448_v12  }
  0x3a   : > { %1192 = vset.pattern.permute.xlu1 %v1275_v16 }
  0x3b   : > { %663 = vperm.xlu1 %1192, %v1396_v5   ;;  %1195 = vset.pattern.permute.xlu0 %v1275_v16 }
  0x3c   : > { %667 = vperm.xlu0 %1195, %v447_v10  }
  0x3f   : > { %1194 = vset.pattern.permute.xlu1 %v1276_v17 }
  0x40   : > { %716 = vperm.xlu1 %1194, %v1396_v5   ;;  %671 = vperm.xlu0 %1195, %v448_v12  }
  0x44   : > { %720 = vperm.xlu1 %1194, %v447_v10   ;;  %1198 = vset.pattern.permute.xlu0 %v1276_v17 }
  0x45   : > { %724 = vperm.xlu0 %1198, %v448_v12  }
  0x48   : > { %1196 = vset.pattern.permute.xlu1 %v1277_v18 }
  0x49   : > { %771 = vperm.xlu1 %1196, %v1396_v5   ;;  %1200 = vset.pattern.permute.xlu0 %v1277_v18 }
  0x4a   : > { %779 = vperm.xlu0 %1200, %v448_v12  }
  0x4d   : > { %775 = vperm.xlu1 %1196, %v447_v10  }
  0x4e   : > { %1201 = vset.pattern.permute.xlu0 %v1278_v19 }
  0x4f   : > { %832 = vperm.xlu0 %1201, %v448_v12  }
  0x51   : > { %1197 = vset.pattern.permute.xlu1 %v1278_v19 }
  0x52   : > { %824 = vperm.xlu1 %1197, %v1396_v5  }
  0x53   : > { %1203 = vset.pattern.permute.xlu0 %v1279_v20 }
  0x54   : > { %887 = vperm.xlu0 %1203, %v448_v12  }
  0x56   : > { %828 = vperm.xlu1 %1197, %v447_v10  }
  0x58   : > { %1204 = vset.pattern.permute.xlu0 %v1271_v2 }
  0x5a   : > { %1199 = vset.pattern.permute.xlu1 %v1279_v20 }
  0x5b   : > { %879 = vperm.xlu1 %1199, %v1396_v5  }
  0x5f   : > { %883 = vperm.xlu1 %1199, %v447_v10  }
  0x63   : > { %1202 = vset.pattern.permute.xlu1 %v1271_v2  ;;  %v939_v2 = vld [vmem:[%s2033_s6] sm:$0xf] }
  0x64   : > { %907 = vperm.xlu1 %1202, %v902_v21  }
  0x68   : > { %912 = vperm.xlu1 %1202, %v903_v22  }
  0x97   : > { %v287_v23 = vpop.permute.xlu0 %286  ;;  %v297_v37 = vpop.permute.xlu1 %296 }
  0x9b   : > { %v292_v28 = vpop.permute.xlu0 %291 }
  0x9c   : > { %v1469_v40 = vpop.permute.xlu1 %451 }
  0xa0   : > { %v1513_v50 = vpop.permute.xlu0 %456 }
  0xa2   : > { %v1477_v42 = vpop.permute.xlu1 %502 }
  0xa4   : > { %v1519_v53 = vpop.permute.xlu0 %461 }
  0xa6   : > { %v1487_v43 = vpop.permute.xlu1 %506 }
  0xa9   : > { %v1529_v56 = vpop.permute.xlu0 %555 }
  0xab   : > { %v1493_v45 = vpop.permute.xlu1 %559 }
  0xad   : > { %v1541_v58 = vpop.permute.xlu0 %563 }
  0xae   : > { %2052 = vst [vmem:[#allocation7_spill] sm:$0xff] %v1541_v58 }
  0xb0   : > { %v1501_v48 = vpop.permute.xlu1 %610 }
  0xb2   : > { %v1549_v60 = vpop.permute.xlu0 %614 }
  0xb5   : > { %v1511_v49 = vpop.permute.xlu1 %510 }
  0xb6   : > { %v1561_v62 = vpop.permute.xlu0 %618 }
  0xb7   : > { %2053 = vst [vmem:[#allocation8_spill] sm:$0xff] %v1561_v62 }
  0xba   : > { %v1521_v54 = vpop.permute.xlu1 %663 }
  0xbb   : > { %v1574_v4 = vpop.permute.xlu0 %667 }
  0xbf   : > { %v1535_v57 = vpop.permute.xlu1 %716  ;;  %v1584_v9 = vpop.permute.xlu0 %671 }
  0xc0   : > { %2055 = vst [vmem:[#allocation10_spill] sm:$0xff] %v1584_v9 }
  0xc3   : > { %v1543_v59 = vpop.permute.xlu1 %720 }
  0xc4   : > { %v1590_v11 = vpop.permute.xlu0 %724 }
  0xc5   : > { %2056 = vst [vmem:[#allocation11_spill] sm:$0xff] %v1590_v11 }
  0xc8   : > { %v1555_v61 = vpop.permute.xlu1 %771 }
  0xc9   : > { %v1598_v13 = vpop.permute.xlu0 %779 }
  0xca   : > { %2057 = vst [vmem:[#allocation12_spill] sm:$0xff] %v1598_v13 }
  0xcc   : > { %v1567_v1 = vpop.permute.xlu1 %775 }
  0xce   : > { %v1604_v15 = vpop.permute.xlu0 %832 }
  0xcf   : > { %2058 = vst [vmem:[#allocation13_spill] sm:$0xff] %v1604_v15 }
  0xd1   : > { %v1578_v5 = vpop.permute.xlu1 %824 }
  0xd3   : > { %v1612_v17 = vpop.permute.xlu0 %887 }
  0xd4   : > { %2059 = vst [vmem:[#allocation14_spill] sm:$0xff] %v1612_v17 }
  0xd5   : > { %v1586_v10 = vpop.permute.xlu1 %828 }
  0xda   : > { %v1594_v12 = vpop.permute.xlu1 %879 }
  0xde   : > { %v1600_v14 = vpop.permute.xlu1 %883 }
  0xe3   : > { %v1606_v16 = vpop.permute.xlu1 %907 }
  0xe7   : > { %v1614_v18 = vpop.permute.xlu1 %912 }
  0xf3   : > { %v382_v24 = vpop.f32.mrb[0].mxu0 }
  0xf4   : > { %v383_v25 = vadd.f32 %v382_v24, %v287_v23  ;;  %v384_v26 = vpop.f32.mrb[1].mxu0 }
  0xf5   : > { %v385_v38 = vadd.f32 %v384_v26, %v287_v23 }
  0xf6   : > { %v399_v27 = vmax.f32 %v383_v25, 0.0 }
  0xf7   : > { %v388_v29 = vpop.f32.mrb[2].mxu0  ;;  %v400_v39 = vmax.f32 %v385_v38, 0.0 }
  0xf8   : > { %v1443_v30 = vmin.f32 %v399_v27, 6.0  ;;  %v389_v31 = vadd.f32 %v388_v29, %v292_v28  ;;  %v390_v32 = vpop.f32.mrb[3].mxu0  ;;  %v411_v29 = vlaneseq }
  0xf9   : > { %v1475_v41 = vmin.f32 %v400_v39, 6.0  ;;  %v391_v44 = vadd.f32 %v390_v32, %v292_v28 }
  0xfa   : > { %578 = vrot.lane.b32.xlu0 %v1443_v30, %s1280_s9  ;;  %470 = vrot.lane.b32.xlu1 %v1443_v30, %s1281_s13  ;;  %v401_v34 = vmax.f32 %v389_v31, 0.0  ;;  %v464_v62 = vmul.f32 %v1469_v40, %v1443_v30 }
  0xfb   : > { %v394_v33 = vpop.f32.mrb[4].mxu0  ;;  %v402_v46 = vmax.f32 %v391_v44, 0.0  ;;  %v465_v58 = vmul.f32 %v1469_v40, %v1475_v41 }
  0xfc   : > { %v1449_v35 = vpop.f32.mrb[5].mxu0  ;;  %v1455_v36 = vmin.f32 %v401_v34, 6.0  ;;  %v395_v51 = vadd.f32 %v394_v33, %v297_v37  ;;  %v1632_v33 = vand.u32 127, %v411_v29 }
  0xfd   : > { %v1499_v47 = vmin.f32 %v402_v46, 6.0  ;;  %v397_v0 = vadd.f32 %v1449_v35, %v297_v37 }
  0xfe   : > { %633 = vrot.lane.b32.xlu0 %v1443_v30, %s1282_s14  ;;  %525 = vrot.lane.b32.xlu1 %v1443_v30, %s1283_s15  ;;  %v403_v52 = vmax.f32 %v395_v51, 0.0  ;;  %v1635_v34 = vadd.s32 128, %v1632_v33  ;;  %v418_v35 = vand.u32 15, %v1632_v33  ;;  %vm2046_vm2 = vcmp.ge.s32.totalorder %v1632_v33, 16 }
  0xff   : > { %v404_v3 = vmax.f32 %v397_v0, 0.0  ;;  %vm482_vm4 = vcmp.lt.s32.totalorder %v1632_v33, 17  ;;  %vm2045_vm6 = vcmp.lt.s32.totalorder %v1632_v33, 16  ;;  %vm590_vm9 = vcmp.lt.s32.totalorder %v1632_v33, 15 }
 0x100   : > { %v1527_v55 = vmin.f32 %v403_v52, 6.0  ;;  %v425_v39 = vand.u32 15, %v1635_v34  ;;  %vm1642_vm3 = vcmp.ge.s32.totalorder %v418_v35, 1  ;;  %vm1672_vm8 = vcmp.lt.s32.totalorder %v418_v35, 15 }
 0x101   : > { %v1580_v8 = vmin.f32 %v404_v3, 6.0  ;;  %vm1653_vm5 = vmand %vm2046_vm2, %vm1642_vm3  ;;  %vm645_vm10 = vcmp.lt.s32.totalorder %v1632_v33, 1  ;;  %vm698_vm13 = vcmp.lt.s32.totalorder %v1632_v33, 127  ;;  %vm441_vm14 = vcmp.lt.s32.totalorder %v1635_v34, 240 }
 0x102   : > { %686 = vrot.lane.b32.xlu0 %v1443_v30, %s1284_s16  ;;  %472 = vrot.lane.b32.xlu1 %v1455_v36, %s1281_s13  ;;  %vm1660_vm7 = vcmp.ge.s32.totalorder %v425_v39, 1  ;;  %vm1689_vm11 = vmand %vm2046_vm2, %vm1672_vm8  ;;  %vm1696_vm12 = vcmp.lt.s32.totalorder %v425_v39, 15  ;;  %vm751_vm15 = vcmp.lt.s32.totalorder %v1632_v33, 113  ;;  %vm806_vm1 = vcmp.lt.s32.totalorder %v1632_v33, 112 }
 0x103   : > { %2054 = vst [vmem:[#allocation9_spill] sm:$0xff] %v1580_v8  ;;  %vm1746_vm0 = vmand %vm441_vm14, %vm1660_vm7 }
 0x106   : > { %739 = vrot.lane.b32.xlu0 %v1443_v30, %s1285_s17  ;;  %527 = vrot.lane.b32.xlu1 %v1455_v36, %s1283_s15 }
 0x10a   : > { %794 = vrot.lane.b32.xlu0 %v1443_v30, %s1286_s18  ;;  %580 = vrot.lane.b32.xlu1 %v1455_v36, %s1280_s9 }
 0x10e   : > { %847 = vrot.lane.b32.xlu0 %v1443_v30, %s1287_s19  ;;  %635 = vrot.lane.b32.xlu1 %v1455_v36, %s1282_s14 }
 0x112   : > { %476 = vrot.lane.b32.xlu0 %v1475_v41, %s1281_s13  ;;  %688 = vrot.lane.b32.xlu1 %v1455_v36, %s1284_s16 }
 0x116   : > { %531 = vrot.lane.b32.xlu0 %v1475_v41, %s1283_s15  ;;  %741 = vrot.lane.b32.xlu1 %v1455_v36, %s1285_s17 }
 0x11a   : > { %584 = vrot.lane.b32.xlu0 %v1475_v41, %s1280_s9  ;;  %796 = vrot.lane.b32.xlu1 %v1455_v36, %s1286_s18 }
 0x11e   : > { %639 = vrot.lane.b32.xlu0 %v1475_v41, %s1282_s14  ;;  %849 = vrot.lane.b32.xlu1 %v1455_v36, %s1287_s19 }
 0x122   : > { %692 = vrot.lane.b32.xlu0 %v1475_v41, %s1284_s16  ;;  %478 = vrot.lane.b32.xlu1 %v1499_v47, %s1281_s13 }
 0x126   : > { %745 = vrot.lane.b32.xlu0 %v1475_v41, %s1285_s17  ;;  %533 = vrot.lane.b32.xlu1 %v1499_v47, %s1283_s15 }
 0x12a   : > { %800 = vrot.lane.b32.xlu0 %v1475_v41, %s1286_s18  ;;  %586 = vrot.lane.b32.xlu1 %v1499_v47, %s1280_s9 }
 0x12e   : > { %853 = vrot.lane.b32.xlu0 %v1475_v41, %s1287_s19  ;;  %641 = vrot.lane.b32.xlu1 %v1499_v47, %s1282_s14 }
 0x132   : > { %474 = vrot.lane.b32.xlu0 %v1527_v55, %s1281_s13  ;;  %694 = vrot.lane.b32.xlu1 %v1499_v47, %s1284_s16 }
 0x136   : > { %529 = vrot.lane.b32.xlu0 %v1527_v55, %s1283_s15  ;;  %747 = vrot.lane.b32.xlu1 %v1499_v47, %s1285_s17 }
 0x13a   : > { %582 = vrot.lane.b32.xlu0 %v1527_v55, %s1280_s9  ;;  %802 = vrot.lane.b32.xlu1 %v1499_v47, %s1286_s18 }
 0x13e   : > { %690 = vrot.lane.b32.xlu0 %v1527_v55, %s1284_s16  ;;  %855 = vrot.lane.b32.xlu1 %v1499_v47, %s1287_s19 }
 0x142   : > { %798 = vrot.lane.b32.xlu0 %v1527_v55, %s1286_s18  ;;  %637 = vrot.lane.b32.xlu1 %v1527_v55, %s1282_s14 }
 0x146   : > { %743 = vrot.lane.b32.xlu1 %v1527_v55, %s1285_s17  ;;  %917 = vperm.xlu0 %1204, %v904_v63  }
 0x14a   : > { %851 = vrot.lane.b32.xlu1 %v1527_v55, %s1287_s19  ;;  %942 = vperm.xlu0 %1204, %v939_v2  }
 0x14e   : > { %480 = vrot.lane.b32.xlu1 %v1580_v8, %s1281_s13 }
 0x152   : > { %535 = vrot.lane.b32.xlu1 %v1580_v8, %s1283_s15 }
 0x156   : > { %588 = vrot.lane.b32.xlu1 %v1580_v8, %s1280_s9  ;;  %s269_s9 = sand.u32 1, %s1260_s25  }
 0x157   : > { %s1106_s13 = sshll.u32 %s269_s9, 3  ;;  %s1029_s20 = scalar_lea.sflag [#allocation3], %s269_s9 }
 0x158   : > { %s271_s15 = scalar_lea.vmem [#allocation2], %s1106_s13 }
 0x15a   : > { %643 = vrot.lane.b32.xlu1 %v1580_v8, %s1282_s14  ;;  %s1121_s14 = sshll.u32 %s1350_s28, 7  ;;  %s1288_s28 = smov [#allocation2]  }
 0x15b   : > { %s1210_s22 = sshll.u32 %s1288_s28, 4  ;;  %s1211_s22 = int_to_ptr.vmem [resolvable:$false] %s1210_s22 }
 0x15c   : > { %s1212_s23 = scalar_lea.vmem %s1211_s22, 256 }
 0x15e   : > { %696 = vrot.lane.b32.xlu1 %v1580_v8, %s1284_s16  ;;  %s1043_s16 = sshll.u32 %s271_s15, 4  ;;  %s1987_s16 = int_to_ptr.vmem [resolvable:$true] %s1043_s16 }
 0x15f   : > { %s1206_s21 = scalar_lea.vmem %s1987_s16, 128  ;;  %p1213_p0 = scmp.lt.s32.totalorder %s1987_s16, %s1211_s22 }
 0x160   : > { %p1207_p11 = scmp.ne.s32.totalorder %s1987_s16, %s1206_s21  ;;  %p1214_p1 = scmp.lt.s32.totalorder %s1212_s23, %s1206_s21 }
 0x162   : > { %749 = vrot.lane.b32.xlu1 %v1580_v8, %s1285_s17  ;;  %p1208_p12 = pnand %p1207_p11, %p1367_p5  ;;  %p1215_p2 = por %p1214_p1, %p1213_p0 }
 0x164   : > { %p1209_p13 = pneg %p1208_p12 }
 0x166   : > { %804 = vrot.lane.b32.xlu1 %v1580_v8, %s1286_s18  ;;  %p1216_p3 = pnand %p1215_p2, %p1209_p13 }
 0x16a   : > { %857 = vrot.lane.b32.xlu1 %v1580_v8, %s1287_s19  ;;  %s1985_s19 = scalar_lea.hbm %s2034_s7, %s1121_s14 }
 0x16c   : > { %v579_v19 = vpop.permute.xlu0 %578  ;;  %v471_v20 = vpop.permute.xlu1 %470 }
 0x170   : > { %v634_v21 = vpop.permute.xlu0 %633  ;;  %v526_v22 = vpop.permute.xlu1 %525 }
 0x174   : > { %v687_v23 = vpop.permute.xlu0 %686  ;;  %v1618_v24 = vpop.permute.xlu1 %472 }
 0x178   : > { %v1620_v25 = vpop.permute.xlu0 %739  ;;  %v1622_v26 = vpop.permute.xlu1 %527 }
 0x17c   : > { %v1624_v27 = vpop.permute.xlu0 %794  ;;  %v1626_v28 = vpop.permute.xlu1 %580 }
 0x180   : > { %v1628_v31 = vpop.permute.xlu0 %847  ;;  %v1630_v32 = vpop.permute.xlu1 %635 }
 0x184   : > { %v477_v37 = vpop.permute.xlu0 %476  ;;  %v1638_v38 = vpop.permute.xlu1 %688 }
 0x185   : > { %v486_v63 = vsel %vm482_vm4, %v477_v37, %v471_v20  ;;  %v483_v2 = vsel %vm482_vm4, %v471_v20, %v477_v37 }
 0x186   : > { %v495_v7 = vsel %vm1653_vm5, %v486_v63, 0.0  ;;  %v496_v15 = vsel %vm1660_vm7, %v483_v2, 0.0 }
 0x187   : > { %v513_v13 = vmul.f32 %v1477_v42, %v495_v7  ;;  %v514_v11 = vmul.f32 %v1477_v42, %v496_v15 }
 0x188   : > { %v532_v46 = vpop.permute.xlu0 %531  ;;  %v1647_v51 = vpop.permute.xlu1 %741 }
 0x189   : > { %v541_v6 = vsel %vm2045_vm6, %v532_v46, %v526_v22  ;;  %v538_v8 = vsel %vm2045_vm6, %v526_v22, %v532_v46  ;;  %v519_v30 = vadd.f32 %v513_v13, %v464_v62  ;;  %v520_v22 = vadd.f32 %v514_v11, %v465_v58 }
 0x18a   : > { %v548_v63 = vsel %vm2046_vm2, %v541_v6, 0.0  ;;  %v567_v46 = vmul.f32 %v1529_v56, %v538_v8 }
 0x18b   : > { %v566_v42 = vmul.f32 %v1529_v56, %v548_v63 }
 0x18c   : > { %v585_v3 = vpop.permute.xlu0 %584  ;;  %v1666_v29 = vpop.permute.xlu1 %796 }
 0x18d   : > { %v594_v2 = vsel %vm590_vm9, %v585_v3, %v579_v19  ;;  %v591_v6 = vsel %vm590_vm9, %v579_v19, %v585_v3  ;;  %v572_v56 = vadd.f32 %v566_v42, %v519_v30  ;;  %v573_v42 = vadd.f32 %v567_v46, %v520_v22 }
 0x18e   : > { %v603_v15 = vsel %vm1689_vm11, %v594_v2, 0.0  ;;  %v604_v40 = vsel %vm1696_vm12, %v591_v6, 0.0  ;;  %v466_v30 = vmul.f32 %v1513_v50, %v1455_v36 }
 0x18f   : > { %v622_v8 = vmul.f32 %v1501_v48, %v604_v40 }
 0x190   : > { %v640_v20 = vpop.permute.xlu0 %639  ;;  %v1680_v37 = vpop.permute.xlu1 %849 }
 0x191   : > { %v649_v7 = vsel %vm645_vm10, %v640_v20, %v634_v21  ;;  %v646_v19 = vsel %vm645_vm10, %v634_v21, %v640_v20  ;;  %v621_v20 = vmul.f32 %v1501_v48, %v603_v15 }
 0x192   : > { %v656_v41 = vsel %vm1642_vm3, %v649_v7, 0.0  ;;  %v657_v62 = vsel %vm1660_vm7, %v646_v19, 0.0 }
 0x193   : > { %v674_v11 = vmul.f32 %v1521_v54, %v656_v41  ;;  %v675_v19 = vmul.f32 %v1521_v54, %v657_v62  ;;  %v627_v40 = vadd.f32 %v621_v20, %v572_v56 }
 0x194   : > { %v693_v39 = vpop.permute.xlu0 %692  ;;  %v479_v3 = vpop.permute.xlu1 %478 }
 0x195   : > { %v699_v63 = vsel %vm698_vm13, %v687_v23, %v693_v39  ;;  %v702_v21 = vsel %vm698_vm13, %v693_v39, %v687_v23  ;;  %v484_v13 = vsel %vm482_vm4, %v1618_v24, %v479_v3  ;;  %v487_v58 = vsel %vm482_vm4, %v479_v3, %v1618_v24 }
 0x196   : > { %v709_v6 = vsel %vm1672_vm8, %v699_v63, 0.0  ;;  %v710_v7 = vsel %vm1696_vm12, %v702_v21, 0.0  ;;  %v497_v39 = vsel %vm1653_vm5, %v487_v58, 0.0  ;;  %v498_v3 = vsel %vm1660_vm7, %v484_v13, 0.0 }
 0x197   : > { %v628_v63 = vadd.f32 %v622_v8, %v573_v42  ;;  %v727_v21 = vmul.f32 %v1535_v57, %v709_v6  ;;  %v680_v62 = vadd.f32 %v674_v11, %v627_v40  ;;  %v515_v13 = vmul.f32 %v1487_v43, %v497_v39 }
 0x198   : > { %v746_v2 = vpop.permute.xlu0 %745  ;;  %v534_v23 = vpop.permute.xlu1 %533  ;;  %v516_v58 = vmul.f32 %v1487_v43, %v498_v3  ;;  %v467_v11 = vmul.f32 %v1513_v50, %v1499_v47 }
 0x199   : > { %v752_v48 = vsel %vm751_vm15, %v1620_v25, %v746_v2  ;;  %v755_v24 = vsel %vm751_vm15, %v746_v2, %v1620_v25  ;;  %v728_v25 = vmul.f32 %v1535_v57, %v710_v7  ;;  %v542_v36 = vsel %vm2045_vm6, %v534_v23, %v1622_v26 }
 0x19a   : > { %v764_v41 = vsel %vm1642_vm3, %v752_v48, 0.0  ;;  %v765_v54 = vsel %vm1746_vm0, %v755_v24, 0.0  ;;  %v681_v20 = vadd.f32 %v675_v19, %v628_v63  ;;  %v539_v57 = vsel %vm2045_vm6, %v1622_v26, %v534_v23 }
 0x19b   : > { %v782_v56 = vmul.f32 %v1555_v61, %v764_v41  ;;  %v783_v43 = vmul.f32 %v1555_v61, %v765_v54  ;;  %v733_v6 = vadd.f32 %v727_v21, %v680_v62  ;;  %v550_v26 = vsel %vm2046_vm2, %v542_v36, 0.0  ;;  %vm1814_vm2 = vmand %vm441_vm14, %vm1696_vm12  ;;  %v938_v21 = vld [vmem:[%s2032_s5] sm:$0xf] }
 0x19c   : > { %v801_v22 = vpop.permute.xlu0 %800  ;;  %v587_v46 = vpop.permute.xlu1 %586  ;;  %v734_v7 = vadd.f32 %v728_v25, %v681_v20  ;;  %vm2047_vm6 = vcmp.lt.s32.totalorder %v1632_v33, 111  ;;  %v521_v48 = vadd.f32 %v515_v13, %v466_v30  ;;  %v522_v24 = vadd.f32 %v516_v58, %v467_v11 }
 0x19d   : > { %v592_v8 = vsel %vm590_vm9, %v1626_v28, %v587_v46  ;;  %v595_v2 = vsel %vm590_vm9, %v587_v46, %v1626_v28  ;;  %v569_v47 = vmul.f32 %v1493_v45, %v539_v57  ;;  %v788_v42 = vadd.f32 %v782_v56, %v733_v6 }
 0x19e   : > { %v606_v50 = vsel %vm1696_vm12, %v592_v8, 0.0  ;;  %v810_v28 = vsel %vm806_vm1, %v801_v22, %v1624_v27  ;;  %v605_v19 = vsel %vm1689_vm11, %v595_v2, 0.0  ;;  %v789_v3 = vadd.f32 %v783_v43, %v734_v7 }
 0x19f   : > { %v568_v30 = vmul.f32 %v1493_v45, %v550_v26  ;;  %v807_v40 = vsel %vm806_vm1, %v1624_v27, %v801_v22  ;;  %v624_v63 = vmul.f32 %v1549_v60, %v606_v50  ;;  %v818_v54 = vsel %vm441_vm14, %v810_v28, 0.0 }
 0x1a0   : > { %v642_v23 = vpop.permute.xlu1 %641  ;;  %v854_v61 = vpop.permute.xlu0 %853  ;;  %v623_v22 = vmul.f32 %v1549_v60, %v605_v19  ;;  %v575_v13 = vadd.f32 %v569_v47, %v522_v24  ;;  %v835_v58 = vmul.f32 %v1578_v5, %v807_v40  ;;  %v836_v8 = vmul.f32 %v1578_v5, %v818_v54 }
 0x1a1   : > { %v647_v39 = vsel %vm645_vm10, %v1630_v32, %v642_v23  ;;  %v650_v41 = vsel %vm645_vm10, %v642_v23, %v1630_v32  ;;  %v860_v45 = vsel %vm2047_vm6, %v1628_v31, %v854_v61  ;;  %v863_v27 = vsel %vm2047_vm6, %v854_v61, %v1628_v31 }
 0x1a2   : > { %v658_v32 = vsel %vm1642_vm3, %v650_v41, 0.0  ;;  %v659_v46 = vsel %vm1660_vm7, %v647_v39, 0.0  ;;  %v574_v20 = vadd.f32 %v568_v30, %v521_v48  ;;  %v872_v60 = vsel %vm1672_vm8, %v860_v45, 0.0 }
 0x1a3   : > { %v873_v56 = vsel %vm1814_vm2, %v863_v27, 0.0  ;;  %v676_v57 = vmul.f32 %v1574_v4, %v658_v32  ;;  %v630_v11 = vadd.f32 %v624_v63, %v575_v13  ;;  %v677_v43 = vmul.f32 %v1574_v4, %v659_v46 }
 0x1a4   : > { %v695_v25 = vpop.permute.xlu1 %694  ;;  %v629_v6 = vadd.f32 %v623_v22, %v574_v20  ;;  %v890_v5 = vmul.f32 %v1594_v12, %v872_v60  ;;  %v891_v48 = vmul.f32 %v1594_v12, %v873_v56  ;;  %v841_v28 = vadd.f32 %v835_v58, %v788_v42 }
 0x1a5   : > { %v700_v62 = vsel %vm698_vm13, %v1638_v38, %v695_v25  ;;  %v703_v31 = vsel %vm698_vm13, %v695_v25, %v1638_v38  ;;  %v842_v19 = vadd.f32 %v836_v8, %v789_v3  ;;  %v683_v39 = vadd.f32 %v677_v43, %v630_v11 }
 0x1a6   : > { %v711_v36 = vsel %vm1672_vm8, %v700_v62, 0.0  ;;  %v712_v38 = vsel %vm1696_vm12, %v703_v31, 0.0  ;;  %v682_v47 = vadd.f32 %v676_v57, %v629_v6  ;;  %v896_v63 = vadd.f32 %v890_v5, %v841_v28 }
 0x1a7   : > { %v729_v7 = vmul.f32 %v1543_v59, %v711_v36  ;;  %v730_v50 = vmul.f32 %v1543_v59, %v712_v38  ;;  %v897_v45 = vadd.f32 %v891_v48, %v842_v19  ;;  %v475_v48 = vpop.permute.xlu0 %474 }
 0x1a8   : > { %v748_v2 = vpop.permute.xlu1 %747 }
 0x1a9   : > { %v753_v26 = vsel %vm751_vm15, %v1647_v51, %v748_v2  ;;  %v756_v23 = vsel %vm751_vm15, %v748_v2, %v1647_v51  ;;  %v735_v51 = vadd.f32 %v729_v7, %v682_v47  ;;  %v736_v42 = vadd.f32 %v730_v50, %v683_v39 }
 0x1aa   : > { %v766_v4 = vsel %vm1642_vm3, %v753_v26, 0.0  ;;  %v767_v24 = vsel %vm1746_vm0, %v756_v23, 0.0  ;;  %v921_v62 = vadd.f32 %v1606_v16, %v897_v45 }
 0x1ab   : > { %v784_v61 = vmul.f32 %v1567_v1, %v766_v4  ;;  %v785_v40 = vmul.f32 %v1567_v1, %v767_v24  ;;  %v530_v24 = vpop.permute.xlu0 %529 }
 0x1ac   : > { %v803_v30 = vpop.permute.xlu1 %802  ;;  %v927_v57 = vmax.f32 %v921_v62, 0.0 }
 0x1ad   : > { %v808_v12 = vsel %vm806_vm1, %v1666_v29, %v803_v30  ;;  %v811_v41 = vsel %vm806_vm1, %v803_v30, %v1666_v29  ;;  %v790_v3 = vadd.f32 %v784_v61, %v735_v51  ;;  %v791_v25 = vadd.f32 %v785_v40, %v736_v42 }
 0x1ae   : > { %v820_v59 = vsel %vm441_vm14, %v811_v41, 0.0  ;;  %v837_v27 = vmul.f32 %v1586_v10, %v808_v12  ;;  %v933_v6 = vmin.f32 %v927_v57, 6.0  ;;  %v468_v42 = vmul.f32 %v1519_v53, %v1527_v55 }
 0x1af   : > { %v838_v32 = vmul.f32 %v1586_v10, %v820_v59  ;;  %v920_v10 = vadd.f32 %v1606_v16, %v896_v63  ;;  %v583_v30 = vpop.permute.xlu0 %582 }
 0x1b0   : > { %v856_v1 = vpop.permute.xlu1 %855  ;;  %v843_v13 = vadd.f32 %v837_v27, %v790_v3  ;;  %v2079_v3 = vld [vmem:[#allocation9_spill] sm:$0xff] }
 0x1b1   : > { %v861_v54 = vsel %vm2047_vm6, %v1680_v37, %v856_v1  ;;  %v864_v29 = vsel %vm2047_vm6, %v856_v1, %v1680_v37  ;;  %v844_v58 = vadd.f32 %v838_v32, %v791_v25  ;;  %v926_v11 = vmax.f32 %v920_v10, 0.0  ;;  %v2080_v1 = vld [vmem:[#allocation7_spill] sm:$0xff]  ;;  %v2081_v10 = vld [vmem:[#allocation8_spill] sm:$0xff] }
 0x1b2   : > { %v874_v22 = vsel %vm1672_vm8, %v861_v54, 0.0  ;;  %v875_v46 = vsel %vm1814_vm2, %v864_v29, 0.0  ;;  %vm2076_vm6 = vcmp.lt.s32.totalorder %v1632_v33, 16  ;;  %v469_v27 = vmul.f32 %v1519_v53, %v2079_v3 }
 0x1b3   : > { %v892_v31 = vmul.f32 %v1600_v14, %v874_v22  ;;  %v893_v36 = vmul.f32 %v1600_v14, %v875_v46  ;;  %v932_v7 = vmin.f32 %v926_v11, 6.0  ;;  %v691_v29 = vpop.permute.xlu0 %690 }
 0x1b4   : > { %v638_v20 = vpop.permute.xlu1 %637 }
 0x1b5   : > { %v898_v60 = vadd.f32 %v892_v31, %v843_v13  ;;  %v899_v56 = vadd.f32 %v893_v36, %v844_v58 }
 0x1b7   : > { %v923_v37 = vadd.f32 %v1614_v18, %v899_v56  ;;  %v922_v8 = vadd.f32 %v1614_v18, %v898_v60  ;;  %v2082_v56 = vld [vmem:[#allocation10_spill] sm:$0xff] }
 0x1b8   : > { %v744_v43 = vpop.permute.xlu1 %743 }
 0x1b9   : > { %v929_v38 = vmax.f32 %v923_v37, 0.0  ;;  %v928_v2 = vmax.f32 %v922_v8, 0.0 }
 0x1bb   : > { %v935_v16 = vmin.f32 %v929_v38, 6.0  ;;  %v934_v26 = vmin.f32 %v928_v2, 6.0  ;;  %v2083_v2 = vld [vmem:[#allocation11_spill] sm:$0xff] }
 0x1bc   : > { %v1891_v23 = vpop.permute.xlu1 %851 }
 0x1bd   : > { %v1122_v5 = vpack.c.bf16 %v935_v16, %v933_v6  ;;  %v1124_v14 = vpack.c.bf16 %v934_v26, %v932_v7 }
 0x1bf   : > { %1123 = vmatprep.subr.bf16.mxu1 %v1122_v5 }
 0x1c0   : > { %v481_v4 = vpop.permute.xlu1 %480  ;;  %1125 = vmatpush1.bf16.msra.mxu1 %v1124_v14 }
 0x1c1   : > { %v485_v18 = vsel %vm482_vm4, %v475_v48, %v481_v4  ;;  %v488_v50 = vsel %vm482_vm4, %v481_v4, %v475_v48  ;;  %vm2077_vm4 = vcmp.ge.s32.totalorder %v1632_v33, 16  ;;  %v2084_v4 = vld [vmem:[#allocation12_spill] sm:$0xff] }
 0x1c2   : > { %v499_v28 = vsel %vm1653_vm5, %v488_v50, 0.0  ;;  %v500_v19 = vsel %vm1660_vm7, %v485_v18, 0.0  ;;  %vm2078_vm5 = vmmov %vm2076_vm6 }
 0x1c3   : > { %v517_v40 = vmul.f32 %v1511_v49, %v499_v28  ;;  %v518_v12 = vmul.f32 %v1511_v49, %v500_v19 }
 0x1c4   : > { %v536_v47 = vpop.permute.xlu1 %535 }
 0x1c5   : > { %v543_v39 = vsel %vm2076_vm6, %v536_v47, %v530_v24  ;;  %v540_v59 = vsel %vm2078_vm5, %v530_v24, %v536_v47  ;;  %v523_v22 = vadd.f32 %v517_v40, %v468_v42  ;;  %v524_v46 = vadd.f32 %v518_v12, %v469_v27  ;;  %v799_v47 = vpop.permute.xlu0 %798  ;;  %v2088_v42 = vld [vmem:[#allocation14_spill] sm:$0xff] }
 0x1c6   : > { %v552_v41 = vsel %vm2077_vm4, %v543_v39, 0.0  ;;  %v571_v62 = vmul.f32 %v2080_v1, %v540_v59 }
 0x1c7   : > { %v570_v25 = vmul.f32 %v2080_v1, %v552_v41 }
 0x1c8   : > { %v589_v61 = vpop.permute.xlu1 %588  ;;  %v577_v57 = vadd.f32 %v571_v62, %v524_v46 }
 0x1c9   : > { %v596_v51 = vsel %vm590_vm9, %v589_v61, %v583_v30  ;;  %v593_v52 = vsel %vm590_vm9, %v583_v30, %v589_v61  ;;  %v576_v60 = vadd.f32 %v570_v25, %v523_v22  ;;  %v2085_v30 = vld [vmem:[#allocation13_spill] sm:$0xff]  ;;  %v918_v25 = vpop.permute.xlu0 %917 }
 0x1ca   : > { %v607_v49 = vsel %vm1689_vm11, %v596_v51, 0.0  ;;  %v608_v54 = vsel %vm1696_vm12, %v593_v52, 0.0 }
 0x1cb   : > { %v625_v35 = vmul.f32 %v2081_v10, %v607_v49  ;;  %v626_v36 = vmul.f32 %v2081_v10, %v608_v54 }
 0x1cc   : > { %v644_v63 = vpop.permute.xlu1 %643 }
 0x1cd   : > { %v651_v45 = vsel %vm645_vm10, %v644_v63, %v638_v20  ;;  %v648_v32 = vsel %vm645_vm10, %v638_v20, %v644_v63  ;;  %v631_v38 = vadd.f32 %v625_v35, %v576_v60  ;;  %v632_v26 = vadd.f32 %v626_v36, %v577_v57  ;;  %v943_v46 = vpop.permute.xlu0 %942  ;;  %v2089_v35 = vld [vmem:[#allocation5_spill] sm:$0xff] }
 0x1ce   : > { %v660_v55 = vsel %vm1642_vm3, %v651_v45, 0.0  ;;  %v661_v13 = vsel %vm1660_vm7, %v648_v32, 0.0 }
 0x1cf   : > { %v678_v37 = vmul.f32 %v2082_v56, %v660_v55  ;;  %v679_v8 = vmul.f32 %v2082_v56, %v661_v13 }
 0x1d0   : > { %v697_v53 = vpop.permute.xlu1 %696 }
 0x1d1   : > { %v701_v58 = vsel %vm698_vm13, %v691_v29, %v697_v53  ;;  %v704_v31 = vsel %vm698_vm13, %v697_v53, %v691_v29  ;;  %v684_v48 = vadd.f32 %v678_v37, %v631_v38  ;;  %v685_v18 = vadd.f32 %v679_v8, %v632_v26 }
 0x1d2   : > { %v713_v20 = vsel %vm1672_vm8, %v701_v58, 0.0  ;;  %v714_v0 = vsel %vm1696_vm12, %v704_v31, 0.0  ;;  %v2090_v58 = vld [vmem:[#allocation6_spill] sm:$0xff] }
 0x1d3   : > { %v731_v6 = vmul.f32 %v2083_v2, %v713_v20  ;;  %v732_v9 = vmul.f32 %v2083_v2, %v714_v0 }
 0x1d4   : > { %v750_v11 = vpop.permute.xlu1 %749 }
 0x1d5   : > { %v754_v16 = vsel %vm751_vm15, %v744_v43, %v750_v11  ;;  %v757_v7 = vsel %vm751_vm15, %v750_v11, %v744_v43  ;;  %v737_v61 = vadd.f32 %v731_v6, %v684_v48  ;;  %v738_v19 = vadd.f32 %v732_v9, %v685_v18 }
 0x1d6   : > { %v768_v5 = vsel %vm1642_vm3, %v754_v16, 0.0  ;;  %v769_v14 = vsel %vm1746_vm0, %v757_v7, 0.0  ;;  %vm2086_vm3 = vcmp.lt.s32.totalorder %v1632_v33, 111 }
 0x1d7   : > { %v786_v24 = vmul.f32 %v2084_v4, %v768_v5  ;;  %v787_v28 = vmul.f32 %v2084_v4, %v769_v14  ;;  %vm2087_vm6 = vmmov %vm2086_vm3 }
 0x1d8   : > { %v805_v50 = vpop.permute.xlu1 %804 }
 0x1d9   : > { %v809_v43 = vsel %vm806_vm1, %v799_v47, %v805_v50  ;;  %v812_v44 = vsel %vm806_vm1, %v805_v50, %v799_v47  ;;  %v792_v39 = vadd.f32 %v786_v24, %v737_v61  ;;  %v793_v41 = vadd.f32 %v787_v28, %v738_v19 }
 0x1da   : > { %v822_v15 = vsel %vm441_vm14, %v812_v44, 0.0  ;;  %v839_v51 = vmul.f32 %v2085_v30, %v809_v43 }
 0x1db   : > { %v840_v40 = vmul.f32 %v2085_v30, %v822_v15 }
 0x1dc   : > { %v858_v12 = vpop.permute.xlu1 %857  ;;  %v845_v45 = vadd.f32 %v839_v51, %v792_v39 }
 0x1dd   : > { %v862_v52 = vsel %vm2086_vm3, %v1891_v23, %v858_v12  ;;  %v865_v63 = vsel %vm2087_vm6, %v858_v12, %v1891_v23  ;;  %v846_v49 = vadd.f32 %v840_v40, %v793_v41 }
 0x1de   : > { %v876_v34 = vsel %vm1672_vm8, %v862_v52, 0.0  ;;  %v877_v59 = vsel %vm1814_vm2, %v865_v63, 0.0  ;;  %vm945_vm2 = vcmask 195584  }
 0x1df   : > { %v894_v3 = vmul.f32 %v2088_v42, %v876_v34  ;;  %v895_v27 = vmul.f32 %v2088_v42, %v877_v59 }
 0x1e1   : > { %v900_v32 = vadd.f32 %v894_v3, %v845_v45  ;;  %v901_v1 = vadd.f32 %v895_v27, %v846_v49 }
 0x1e3   : > { %v924_v54 = vadd.f32 %v918_v25, %v900_v32  ;;  %v925_v29 = vadd.f32 %v918_v25, %v901_v1 }
 0x1e5   : > { %v930_v33 = vmax.f32 %v924_v54, 0.0  ;;  %v931_v23 = vmax.f32 %v925_v29, 0.0 }
 0x1e7   : > { %v936_v17 = vmin.f32 %v930_v33, 6.0  ;;  %v937_v22 = vmin.f32 %v931_v23, 6.0 }
 0x1e9   : > { %953 = vmatprep.subr.mxu1 %v937_v22 }
 0x1ea   : > { %954 = vmatpush1.msra.mxu1 %v936_v17 }
 0x1eb   : > { %1114 = vmatmul.mubr.msk.f32.vlgmr.msra.gmra.mrb[0].mxu1 %vm945_vm2, %v938_v21 }
 0x2be   : > { %v1015_v62 = vpop.f32.mrb[0].mxu1 }
 0x2bf   : > { %v1016_v55 = vadd.f32 %v1015_v62, %v943_v46  ;;  %v1017_v53 = vpop.f32.mrb[1].mxu1 }
 0x2c0   : > { %v1018_v10 = vadd.f32 %v1017_v53, %v943_v46 }
 0x2c1   : > { %v1021_v13 = vadd.f32 %v1016_v55, %v2089_v35 }
 0x2c2   : > { %v1022_v31 = vadd.f32 %v1018_v10, %v2090_v58 }
 0x2c4   : > { %v1025_v36 = vcombine.low %v1021_v13, %v1022_v31 }
 0x2c6   : > { %1027 = vst [vmem:[%s271_s15] sm:$0xff] %v1025_v36 }
 0x2c7   : > { %1219 = shalt.err (!%p1216_p3)
}
 0x2c8   : > { %s1220_s29 = scalar_lea.hbm %s1985_s19, 128  ;;  %s1224_s13 = scalar_lea.hbm %s2034_s7, 256 }
 0x2c9   : > { %p1221_p4 = scmp.ne.s32.totalorder %s1985_s19, %s1220_s29  ;;  %p1225_p9 = scmp.lt.u32.totalorder %s1985_s19, %s2034_s7 }
 0x2ca   : > { %p1226_p10 = scmp.lt.u32.totalorder %s1224_s13, %s1220_s29  ;;  %p1228_p12 = scmp.lt.u32.totalorder %s1220_s29, %s1985_s19 }
 0x2cb   : > { %p1222_p7 = pnand %p1221_p4, %p1367_p5 }
 0x2cc   : > { %p1227_p11 = por %p1226_p10, %p1225_p9 }
 0x2cd   : > { %p1223_p8 = pneg %p1222_p7 }
 0x2ce   : > { %p1229_p13 = por %p1228_p12, %p1227_p11 }
 0x2d0   : > { %p1230_p0 = pnand %p1229_p13, %p1223_p8 }
 0x2d2   : > { %1233 = shalt.err (!%p1230_p0)
}
 0x2d3   : > { %1126 = dma.vmem_to_hbm [thread:$0]  (%p1367_p5), %s1987_s16, 128, %s1985_s19, %s1029_s20  }
 0x2d4 PF: > { %p1132_p1 = scmp.ge.s32.totalorder %s1268_s27, 2  ;;  %s1055_s17 = sand.u32 1, %s1256_s24  }
 0x2d5   : > { %s1056_s18 = scalar_lea.sflag [#allocation3], %s1055_s17 }
 0x2d6   : > { %p1129_p2 = pnand %p1132_p1, %p1371_p6 }
 0x2d8   : > { %1251 = dma.done.wait (!%p1129_p2), %s1056_s18, 128  }
 0x2d9   : > { %1253 = vsyncadd (!%p1129_p2), %s1056_s18, 4294967168  ;;  %p17_p3 = scmp.ge.s32.totalorder %s1354_s30, 4   ;;  %s2091_s24 = smov %s1260_s25 }
 0x2da   : > { %s2092_s25 = smov %s1264_s26  ;;  %s2093_s26 = smov %s1365_s10 }
 0x2db   : > { %s2094_s27 = smov %s1354_s30  ;;  %19 = sbr.rel (!%p17_p3) target bundleno = 3 (0x3), region = 83 }
 0x2e2   :  { %1061 = vsyncpa [#allocation3], 1 }
 0x2e3   :  { %1063 = vsyncpa [#allocation3 + $0x1], 1 }

</bundles_post_ra>
